<compile_context>
chip_gen: v5e
topology: v5e:2x2
jax: 0.10.0
libtpu: 0.0.40
codegen_flags: <defaults>
</compile_context>

<pallas_src>
import functools
import math

import jax
import jax.numpy as jnp
from jax import lax
from jax.experimental import pallas as pl
from jax.experimental.pallas import tpu as pltpu


def _mha_kernel(x_ref, w_in_ref, b_in_ref, w_out_ref, b_out_ref, o_ref, *,
                num_heads):
    # x block: (Bt, S, E) f32.  w_in: (E, 3E) bf16, w_out: (E, E) bf16,
    # b_in: (1, 3E) f32, b_out: (1, E) f32.
    x = x_ref[...]
    Bt, S, E = x.shape
    H = num_heads
    Dh = E // H
    scale = 1.0 / math.sqrt(Dh)

    # Lane-dense 2-D view; bf16 operands, f32 MXU accumulation.
    x2 = x.reshape(Bt * S, E).astype(jnp.bfloat16)

    # --- packed QKV projection: one wide matmul instead of 3*H narrow ones ---
    qkv = jnp.dot(x2, w_in_ref[...], preferred_element_type=jnp.float32)
    qkv = qkv + b_in_ref[...]                              # (Bt*S, 3E) f32

    heads_out = []
    for h in range(H):        # H is small; loop body is attention only
        # Static lane slices of the packed projection (q | k | v layout).
        q = qkv[:, h * Dh:(h + 1) * Dh].reshape(Bt, S, Dh)
        k = qkv[:, E + h * Dh:E + (h + 1) * Dh].reshape(Bt, S, Dh)
        v = qkv[:, 2 * E + h * Dh:2 * E + (h + 1) * Dh].reshape(Bt, S, Dh)

        q = (q * scale).astype(jnp.bfloat16)               # scale the small tensor
        k = k.astype(jnp.bfloat16)
        v = v.astype(jnp.bfloat16)

        # s = q @ k^T : contract last dims directly, batch over the batch tile.
        s = lax.dot_general(q, k, (((2,), (2,)), ((0,), (0,))),
                            preferred_element_type=jnp.float32)   # (Bt, S, S) f32

        # Numerically stable softmax with deferred normalization.
        m = jnp.max(s, axis=-1, keepdims=True)
        p = jnp.exp(s - m)
        l = jnp.sum(p, axis=-1, keepdims=True)              # (Bt, S, 1)

        oh = lax.dot_general(p.astype(jnp.bfloat16), v,
                             (((2,), (1,)), ((0,), (0,))),
                             preferred_element_type=jnp.float32)  # (Bt, S, Dh)
        # Normalize the small (S, Dh) tile; reciprocal goes to the EUP slot.
        oh = oh * pl.reciprocal(l, approx=True)
        heads_out.append(oh.reshape(Bt * S, Dh))

    # --- head concat (lane dim) + single K=E output projection ---
    concat = jnp.concatenate(heads_out, axis=-1)             # (Bt*S, E)
    out = jnp.dot(concat.astype(jnp.bfloat16), w_out_ref[...],
                  preferred_element_type=jnp.float32) + b_out_ref[...]
    o_ref[...] = out.reshape(Bt, S, E).astype(o_ref.dtype)


def _pick_batch_tile(B, S, E, vmem_budget=40 << 20):
    """Largest divisor of B whose full per-step VMEM footprint (tiles + weights +
    packed qkv + score/prob tensor) fits a budget safe on v5e/v6e/v7x."""
    # Constant weight/bias blocks (bf16 weights), double-buffered by the pipeline.
    fixed = 2 * ((E * 3 * E + E * E) * 2 + (3 * E + E) * 4)
    # Per-sample live bytes: x + out tiles (f32, double-buffered), packed qkv (f32),
    # one head's score + prob tensors, concat buffer and per-head temporaries.
    per_sample = (2 * 2 * S * E * 4          # x and out tiles, 2 buffers each
                  + S * 3 * E * 4            # packed qkv, f32
                  + 2 * S * S * 4            # s and p (one head live at a time)
                  + 3 * S * E * 4)           # concat + q/k/v/oh slack
    avail = max(vmem_budget - fixed, per_sample)
    bt = int(max(1, min(B, avail // per_sample)))
    # Keep >= 2 grid steps so v7x's two TensorCores both get work.
    if B >= 2:
        bt = max(1, min(bt, B // 2))
    while B % bt:
        bt -= 1
    est_bytes = fixed + bt * per_sample
    return bt, est_bytes


def multi_head_sa(x, in_proj_w, in_proj_b, out_proj_w, out_proj_b, num_heads):
    """x: (B, S, E) float32 (batch_first). Self-attention with q = k = v = x."""
    B, S, E = x.shape
    H = num_heads
    assert E % H == 0, "embed dim must be divisible by num_heads"

    # y = x @ W.T  ->  keep weights as (E_in, E_out); bf16 operands, f32 biases.
    w_in = in_proj_w.T.astype(jnp.bfloat16)                 # (E, 3E)
    b_in = in_proj_b.reshape(1, 3 * E).astype(jnp.float32)  # (1, 3E)
    w_out = out_proj_w.T.astype(jnp.bfloat16)               # (E, E)
    b_out = out_proj_b.reshape(1, E).astype(jnp.float32)    # (1, E)

    Bt, vmem_est = _pick_batch_tile(B, S, E)
    grid = (B // Bt,)
    # Derive the scoped-VMEM limit from the budget; cap below v7x's 64 MiB.
    vmem_limit = int(min(48 << 20, max(32 << 20, int(vmem_est * 3 // 2))))

    # Advisory cost hint for XLA scheduling around this call.
    flops = B * (8 * S * E * E + 4 * S * S * E)
    transcendentals = B * H * S * S
    bytes_accessed = 4 * 2 * B * S * E + 2 * 4 * E * E + 4 * 4 * E

    kernel = functools.partial(_mha_kernel, num_heads=H)
    out = pl.pallas_call(
        kernel,
        out_shape=jax.ShapeDtypeStruct((B, S, E), x.dtype),
        grid_spec=pltpu.PrefetchScalarGridSpec(
            num_scalar_prefetch=0,
            grid=grid,
            in_specs=[
                pl.BlockSpec((Bt, S, E), lambda b: (b, 0, 0)),   # x (batch tile)
                pl.BlockSpec((E, 3 * E), lambda b: (0, 0)),      # packed W_in (bf16)
                pl.BlockSpec((1, 3 * E), lambda b: (0, 0)),      # packed in bias
                pl.BlockSpec((E, E), lambda b: (0, 0)),          # W_out (bf16)
                pl.BlockSpec((1, E), lambda b: (0, 0)),          # out bias
            ],
            out_specs=pl.BlockSpec((Bt, S, E), lambda b: (b, 0, 0)),
        ),
        compiler_params=pltpu.CompilerParams(
            dimension_semantics=("parallel",),
            vmem_limit_bytes=vmem_limit),
        cost_estimate=pl.CostEstimate(
            flops=flops, transcendentals=transcendentals,
            bytes_accessed=bytes_accessed),
    )(x, w_in, b_in, w_out, b_out)
    return out


def _reference(x, in_proj_w, in_proj_b, out_proj_w, out_proj_b, num_heads):
    B, S, E = x.shape
    H = num_heads
    Dh = E // H
    qkv = x @ in_proj_w.T + in_proj_b                        # (B, S, 3E)
    q, k, v = jnp.split(qkv, 3, axis=-1)
    def heads(t):
        return t.reshape(B, S, H, Dh).transpose(0, 2, 1, 3)  # (B, H, S, Dh)
    q, k, v = heads(q), heads(k), heads(v)
    s = jnp.einsum('bhqd,bhkd->bhqk', q, k) / math.sqrt(Dh)
    p = jax.nn.softmax(s, axis=-1)
    o = jnp.einsum('bhqk,bhkd->bhqd', p, v)
    o = o.transpose(0, 2, 1, 3).reshape(B, S, E)
    return o @ out_proj_w.T + out_proj_b


if __name__ == "__main__":
    B, S, E, H = 2, 8, 32, 2     # batch, seq, c1 (embed dim), heads

    key = jax.random.PRNGKey(0)
    kx, k1, k2, k3, k4 = jax.random.split(key, 5)
    x = jax.random.normal(kx, (B, S, E), dtype=jnp.float32)
    in_proj_w = jax.random.normal(k1, (3 * E, E), dtype=jnp.float32) / math.sqrt(E)
    in_proj_b = jax.random.normal(k2, (3 * E,), dtype=jnp.float32) * 0.1
    out_proj_w = jax.random.normal(k3, (E, E), dtype=jnp.float32) / math.sqrt(E)
    out_proj_b = jax.random.normal(k4, (E,), dtype=jnp.float32) * 0.1

    out = multi_head_sa(x, in_proj_w, in_proj_b, out_proj_w, out_proj_b, H)
    jax.block_until_ready(out)

    ref = _reference(x, in_proj_w, in_proj_b, out_proj_w, out_proj_b, H)
    assert out.shape == (B, S, E)
    # bf16 MXU operands + approximate reciprocal -> looser tolerance vs f32 ref.
    assert jnp.allclose(out, ref, atol=5e-2, rtol=5e-2), "mismatch vs reference"
    print("KERNEL_OK")
</pallas_src>

<mosaic_0001>
module attributes {stable_mosaic.version = 11 : i64} {
  func.func @_mha_kernel(%arg0: i32, %arg1: memref<1x8x32xf32, #tpu.memory_space<vmem>>, %arg2: memref<32x96xbf16, #tpu.memory_space<vmem>>, %arg3: memref<1x96xf32, #tpu.memory_space<vmem>>, %arg4: memref<32x32xbf16, #tpu.memory_space<vmem>>, %arg5: memref<1x32xf32, #tpu.memory_space<vmem>>, %arg6: memref<1x8x32xf32, #tpu.memory_space<vmem>>) attributes {dimension_semantics = [#tpu.dimension_semantics<parallel>], iteration_bounds = array<i64: 2>, scalar_prefetch = 0 : i64, scratch_operands = 0 : i64, tpu.core_type = #tpu.core_type<tc>, window_params = [{transform_indices = @transform_0, window_bounds = array<i64: 1, 8, 32>}, {pipeline_mode = #tpu.pipeline_mode<synchronous>, transform_indices = @transform_1, window_bounds = array<i64: 32, 96>}, {pipeline_mode = #tpu.pipeline_mode<synchronous>, transform_indices = @transform_2, window_bounds = array<i64: 1, 96>}, {pipeline_mode = #tpu.pipeline_mode<synchronous>, transform_indices = @transform_3, window_bounds = array<i64: 32, 32>}, {pipeline_mode = #tpu.pipeline_mode<synchronous>, transform_indices = @transform_4, window_bounds = array<i64: 1, 32>}, {transform_indices = @transform_5, window_bounds = array<i64: 1, 8, 32>}]} {
    %c0 = arith.constant 0 : index
    %c0_0 = arith.constant 0 : index
    %c0_1 = arith.constant 0 : index
    %0 = vector.load %arg1[%c0, %c0_0, %c0_1] : memref<1x8x32xf32, #tpu.memory_space<vmem>>, vector<1x8x32xf32>
    %1 = vector.shape_cast %0 : vector<1x8x32xf32> to vector<8x32xf32>
    %2 = arith.truncf %1 : vector<8x32xf32> to vector<8x32xbf16>
    %c0_2 = arith.constant 0 : index
    %c0_3 = arith.constant 0 : index
    %3 = vector.load %arg2[%c0_2, %c0_3] : memref<32x96xbf16, #tpu.memory_space<vmem>>, vector<32x96xbf16>
    %cst = arith.constant dense<0.000000e+00> : vector<8x96xf32>
    %4 = tpu.matmul %2, %3, %cst {dimension_numbers = #tpu.dot_dimension_numbers<[1], [0], [0], [1], [0, 0, 1, 1], [], []>} : vector<8x32xbf16>, vector<32x96xbf16>, vector<8x96xf32> -> vector<8x96xf32>
    %c0_4 = arith.constant 0 : index
    %c0_5 = arith.constant 0 : index
    %5 = vector.load %arg3[%c0_4, %c0_5] : memref<1x96xf32, #tpu.memory_space<vmem>>, vector<1x96xf32>
    %6 = vector.broadcast %5 : vector<1x96xf32> to vector<8x96xf32>
    %7 = arith.addf %4, %6 : vector<8x96xf32>
    %8 = vector.extract_strided_slice %7 {offsets = [0, 0], sizes = [8, 16], strides = [1, 1]} : vector<8x96xf32> to vector<8x16xf32>
    %9 = vector.shape_cast %8 : vector<8x16xf32> to vector<1x8x16xf32>
    %10 = vector.extract_strided_slice %7 {offsets = [0, 32], sizes = [8, 16], strides = [1, 1]} : vector<8x96xf32> to vector<8x16xf32>
    %11 = vector.shape_cast %10 : vector<8x16xf32> to vector<1x8x16xf32>
    %12 = vector.extract_strided_slice %7 {offsets = [0, 64], sizes = [8, 16], strides = [1, 1]} : vector<8x96xf32> to vector<8x16xf32>
    %13 = vector.shape_cast %12 : vector<8x16xf32> to vector<1x8x16xf32>
    %cst_6 = arith.constant 2.500000e-01 : f32
    %14 = vector.broadcast %cst_6 : f32 to vector<1x8x16xf32>
    %15 = arith.mulf %9, %14 : vector<1x8x16xf32>
    %16 = arith.truncf %15 : vector<1x8x16xf32> to vector<1x8x16xbf16>
    %17 = arith.truncf %11 : vector<1x8x16xf32> to vector<1x8x16xbf16>
    %18 = arith.truncf %13 : vector<1x8x16xf32> to vector<1x8x16xbf16>
    %cst_7 = arith.constant dense<0.000000e+00> : vector<1x8x8xf32>
    %19 = tpu.matmul %16, %17, %cst_7 {dimension_numbers = #tpu.dot_dimension_numbers<[2], [2], [1], [1], [0, 0, 0, 1, 1, 1], [0], [0]>} : vector<1x8x16xbf16>, vector<1x8x16xbf16>, vector<1x8x8xf32> -> vector<1x8x8xf32>
    %cst_8 = arith.constant dense<0xFF800000> : vector<1x8xf32>
    %20 = vector.multi_reduction <maximumf>, %19, %cst_8 [2] : vector<1x8x8xf32> to vector<1x8xf32>
    %21 = vector.shape_cast %20 : vector<1x8xf32> to vector<1x8x1xf32>
    %22 = vector.broadcast %21 : vector<1x8x1xf32> to vector<1x8x8xf32>
    %23 = arith.subf %19, %22 : vector<1x8x8xf32>
    %24 = math.exp %23 : vector<1x8x8xf32>
    %cst_9 = arith.constant dense<0.000000e+00> : vector<1x8xf32>
    %25 = vector.multi_reduction <add>, %24, %cst_9 [2] : vector<1x8x8xf32> to vector<1x8xf32>
    %26 = vector.shape_cast %25 : vector<1x8xf32> to vector<1x8x1xf32>
    %27 = arith.truncf %24 : vector<1x8x8xf32> to vector<1x8x8xbf16>
    %cst_10 = arith.constant dense<0.000000e+00> : vector<1x8x16xf32>
    %28 = tpu.matmul %27, %18, %cst_10 {dimension_numbers = #tpu.dot_dimension_numbers<[2], [1], [1], [2], [0, 0, 0, 1, 1, 2], [0], [0]>} : vector<1x8x8xbf16>, vector<1x8x16xbf16>, vector<1x8x16xf32> -> vector<1x8x16xf32>
    %29 = tpu.reciprocal %26 {approx = true} : vector<1x8x1xf32> -> vector<1x8x1xf32>
    %30 = vector.broadcast %29 : vector<1x8x1xf32> to vector<1x8x16xf32>
    %31 = arith.mulf %28, %30 : vector<1x8x16xf32>
    %32 = vector.shape_cast %31 : vector<1x8x16xf32> to vector<8x16xf32>
    %33 = vector.extract_strided_slice %7 {offsets = [0, 16], sizes = [8, 16], strides = [1, 1]} : vector<8x96xf32> to vector<8x16xf32>
    %34 = vector.shape_cast %33 : vector<8x16xf32> to vector<1x8x16xf32>
    %35 = vector.extract_strided_slice %7 {offsets = [0, 48], sizes = [8, 16], strides = [1, 1]} : vector<8x96xf32> to vector<8x16xf32>
    %36 = vector.shape_cast %35 : vector<8x16xf32> to vector<1x8x16xf32>
    %37 = vector.extract_strided_slice %7 {offsets = [0, 80], sizes = [8, 16], strides = [1, 1]} : vector<8x96xf32> to vector<8x16xf32>
    %38 = vector.shape_cast %37 : vector<8x16xf32> to vector<1x8x16xf32>
    %cst_11 = arith.constant 2.500000e-01 : f32
    %39 = vector.broadcast %cst_11 : f32 to vector<1x8x16xf32>
    %40 = arith.mulf %34, %39 : vector<1x8x16xf32>
    %41 = arith.truncf %40 : vector<1x8x16xf32> to vector<1x8x16xbf16>
    %42 = arith.truncf %36 : vector<1x8x16xf32> to vector<1x8x16xbf16>
    %43 = arith.truncf %38 : vector<1x8x16xf32> to vector<1x8x16xbf16>
    %cst_12 = arith.constant dense<0.000000e+00> : vector<1x8x8xf32>
    %44 = tpu.matmul %41, %42, %cst_12 {dimension_numbers = #tpu.dot_dimension_numbers<[2], [2], [1], [1], [0, 0, 0, 1, 1, 1], [0], [0]>} : vector<1x8x16xbf16>, vector<1x8x16xbf16>, vector<1x8x8xf32> -> vector<1x8x8xf32>
    %cst_13 = arith.constant dense<0xFF800000> : vector<1x8xf32>
    %45 = vector.multi_reduction <maximumf>, %44, %cst_13 [2] : vector<1x8x8xf32> to vector<1x8xf32>
    %46 = vector.shape_cast %45 : vector<1x8xf32> to vector<1x8x1xf32>
    %47 = vector.broadcast %46 : vector<1x8x1xf32> to vector<1x8x8xf32>
    %48 = arith.subf %44, %47 : vector<1x8x8xf32>
    %49 = math.exp %48 : vector<1x8x8xf32>
    %cst_14 = arith.constant dense<0.000000e+00> : vector<1x8xf32>
    %50 = vector.multi_reduction <add>, %49, %cst_14 [2] : vector<1x8x8xf32> to vector<1x8xf32>
    %51 = vector.shape_cast %50 : vector<1x8xf32> to vector<1x8x1xf32>
    %52 = arith.truncf %49 : vector<1x8x8xf32> to vector<1x8x8xbf16>
    %cst_15 = arith.constant dense<0.000000e+00> : vector<1x8x16xf32>
    %53 = tpu.matmul %52, %43, %cst_15 {dimension_numbers = #tpu.dot_dimension_numbers<[2], [1], [1], [2], [0, 0, 0, 1, 1, 2], [0], [0]>} : vector<1x8x8xbf16>, vector<1x8x16xbf16>, vector<1x8x16xf32> -> vector<1x8x16xf32>
    %54 = tpu.reciprocal %51 {approx = true} : vector<1x8x1xf32> -> vector<1x8x1xf32>
    %55 = vector.broadcast %54 : vector<1x8x1xf32> to vector<1x8x16xf32>
    %56 = arith.mulf %53, %55 : vector<1x8x16xf32>
    %57 = vector.shape_cast %56 : vector<1x8x16xf32> to vector<8x16xf32>
    %58 = tpu.concatenate %32, %57 in 1 : vector<8x16xf32>, vector<8x16xf32> -> vector<8x32xf32>
    %59 = arith.truncf %58 : vector<8x32xf32> to vector<8x32xbf16>
    %c0_16 = arith.constant 0 : index
    %c0_17 = arith.constant 0 : index
    %60 = vector.load %arg4[%c0_16, %c0_17] : memref<32x32xbf16, #tpu.memory_space<vmem>>, vector<32x32xbf16>
    %cst_18 = arith.constant dense<0.000000e+00> : vector<8x32xf32>
    %61 = tpu.matmul %59, %60, %cst_18 {dimension_numbers = #tpu.dot_dimension_numbers<[1], [0], [0], [1], [0, 0, 1, 1], [], []>} : vector<8x32xbf16>, vector<32x32xbf16>, vector<8x32xf32> -> vector<8x32xf32>
    %c0_19 = arith.constant 0 : index
    %c0_20 = arith.constant 0 : index
    %62 = vector.load %arg5[%c0_19, %c0_20] : memref<1x32xf32, #tpu.memory_space<vmem>>, vector<1x32xf32>
    %63 = vector.broadcast %62 : vector<1x32xf32> to vector<8x32xf32>
    %64 = arith.addf %61, %63 : vector<8x32xf32>
    %65 = vector.shape_cast %64 : vector<8x32xf32> to vector<1x8x32xf32>
    %c0_21 = arith.constant 0 : index
    %c0_22 = arith.constant 0 : index
    %c0_23 = arith.constant 0 : index
    %66 = vector.load %arg6[%c0_21, %c0_22, %c0_23] : memref<1x8x32xf32, #tpu.memory_space<vmem>>, vector<1x8x32xf32>
    tpu.vector_store %arg6[%c0_21, %c0_22, %c0_23], %65 {strides = array<i32>} : memref<1x8x32xf32, #tpu.memory_space<vmem>>, vector<1x8x32xf32>,
    return
  }
  func.func @transform_0(%arg0: i32) -> (i32, i32, i32) {
    %c0_i32 = arith.constant 0 : i32
    %c0_i32_0 = arith.constant 0 : i32
    %c0_i32_1 = arith.constant 0 : i32
    return %arg0, %c0_i32, %c0_i32_0 : i32, i32, i32
  }
  func.func @transform_1(%arg0: i32) -> (i32, i32) {
    %c0_i32 = arith.constant 0 : i32
    %c0_i32_0 = arith.constant 0 : i32
    %c0_i32_1 = arith.constant 0 : i32
    return %c0_i32, %c0_i32_0 : i32, i32
  }
  func.func @transform_2(%arg0: i32) -> (i32, i32) {
    %c0_i32 = arith.constant 0 : i32
    %c0_i32_0 = arith.constant 0 : i32
    %c0_i32_1 = arith.constant 0 : i32
    return %c0_i32, %c0_i32_0 : i32, i32
  }
  func.func @transform_3(%arg0: i32) -> (i32, i32) {
    %c0_i32 = arith.constant 0 : i32
    %c0_i32_0 = arith.constant 0 : i32
    %c0_i32_1 = arith.constant 0 : i32
    return %c0_i32, %c0_i32_0 : i32, i32
  }
  func.func @transform_4(%arg0: i32) -> (i32, i32) {
    %c0_i32 = arith.constant 0 : i32
    %c0_i32_0 = arith.constant 0 : i32
    %c0_i32_1 = arith.constant 0 : i32
    return %c0_i32, %c0_i32_0 : i32, i32
  }
  func.func @transform_5(%arg0: i32) -> (i32, i32, i32) {
    %c0_i32 = arith.constant 0 : i32
    %c0_i32_0 = arith.constant 0 : i32
    %c0_i32_1 = arith.constant 0 : i32
    return %arg0, %c0_i32, %c0_i32_0 : i32, i32, i32
  }
}

</mosaic_0001>

<bundles_post_ra>
// kernel: tpu_custom_call.1
= control target key start
LH: loop header
LB: loop body
LE: loop exit
PB: predicated region body
PF: predicated region fallthrough
CT: control target
= control target key end

     0   :  { %10 = vsyncpa [#allocation3], 0  ;;  %s1083_s0 = inlined_call_operand.hbm [shape: f32[2,8,32], index: 0, kind: input, shape index: {}]   ;;  %s1084_s1 = inlined_call_operand.hbm [shape: bf16[32,96], index: 1, kind: input, shape index: {}]   ;;  %s1085_s2 = inlined_call_operand.vmem [shape: f32[1,96], index: 2, kind: input, shape index: {}]   ;;  %s1086_s3 = inlined_call_operand.hbm [shape: bf16[32,32], index: 3, kind: input, shape index: {}]   ;;  %s1087_s4 = inlined_call_operand.vmem [shape: f32[1,32], index: 4, kind: input, shape index: {}]   ;;  %s1088_s5 = inlined_call_operand.hbm [shape: f32[2,8,32], index: 5, kind: output, shape index: {}]  }
   0x1   :  { %12 = vsyncpa [#allocation3 + $0x1], 0 }
   0x2   :  { %13 = vsyncpa [#allocation6], 0 }
   0x3   :  { %14 = vsyncpa [#allocation4], 0 }
   0x4   :  { %16 = vsyncpa [#allocation4 + $0x1], 0  ;;  %s914_s18 = smov 0   ;;  %s916_s19 = smov 0  }
   0x5   :  { %s918_s20 = smov 0   ;;  %s920_s21 = smov 0  }
   0x6 LB: > { %s174_s24 = sshll.u32 %s1084_s1, 4  ;;  %s938_s25 = sadd.s32 4294967295, %s872_s21   ;;  %s872_s21 = sphi %s920_s21, %s1099_s21   ;;  %s868_s20 = sphi %s918_s20, %s1098_s20   ;;  %s864_s19 = sphi %s916_s19, %s1097_s19   ;;  %s860_s18 = sphi %s914_s18, %s1096_s18   ;;  %s175_s24 = int_to_ptr.hbm [resolvable:$true] %s174_s24 }
   0x7   : > { %p586_p0 = scmp.ge.s32.totalorder %s872_s21, 1  ;;  %p43_p1 = scmp.eq.s32.totalorder %s938_s25, 0 }
   0x8   : > { %p163_p2 = scmp.lt.s32.totalorder %s872_s21, 3  ;;  %s874_s27 = smov [#allocation5]  }
   0x9   : > { %s176_s28 = sshll.u32 %s874_s27, 4  ;;  %s191_s6 = sshll.u32 %s1086_s3, 4  ;;  %s177_s28 = int_to_ptr.vmem [resolvable:$true] %s176_s28  ;;  %s192_s6 = int_to_ptr.hbm [resolvable:$true] %s191_s6 }
   0xa   : > { %p943_p3 = pnand %p586_p0, %p163_p2  ;;  %s875_s7 = smov [#allocation7]  }
   0xb   : > { %s193_s8 = sshll.u32 %s875_s7, 4  ;;  %s876_s9 = smov 64   ;;  %s194_s8 = int_to_ptr.vmem [resolvable:$true] %s193_s8 }
   0xc   : > { %p639_p4 = pneg %p943_p3  ;;  %s877_s10 = smov 4  }
   0xd   : > { %s585_s11 = sadd.s32 4294967294, %s872_s21   ;;  %s957_s12 = sadd.s32 1, %s872_s21  }
   0xe   : > { %p640_p6 = pnand %p639_p4, %p43_p1  ;;  %s26_s13 = ssub.s32 %s872_s21, %s957_s12 }
   0xf   : > { %s29_s14 = sadd.s32 1, %s868_s20  ;;  %p27_p7 = scmp.eq.s32.totalorder %s26_s13, 0 }
  0x10   : > { %642 = dma.hbm_to_vmem [thread:$0]  (!%p640_p6), %s175_s24, 256, %s177_s28, [#allocation6], %s876_s9, %s876_s9, %s877_s10  }
  0x11   : > { %645 = dma.hbm_to_vmem [thread:$0]  (!%p640_p6), %s192_s6, 256, %s194_s8, [#allocation6], %s876_s9, %s876_s9, %s877_s10  }
  0x12   : > { %p36_p8 = scmp.ne.s32.totalorder %s868_s20, %s864_s19  ;;  %p37_p9 = scmp.eq.s32.totalorder %s872_s21, 0 }
  0x13   : > { %p42_p10 = scmp.ne.s32.totalorder %s864_s19, %s860_s18  ;;  %p150_p13 = scmp.eq.s32.totalorder %s938_s25, 1 }
  0x14   : > { %s968_s15 = scalar_select %p27_p7, %s868_s20, %s29_s14  }
  0x15   : > { %p970_p11 = por %p37_p9, %p36_p8  ;;  %p976_p12 = por %p43_p1, %p42_p10 }
  0x16   : > { %p156_p0 = scmp.eq.s32.totalorder %s585_s11, 1  ;;  %p656_p2 = scmp.lt.s32.totalorder %s872_s21, 2 }
  0x17   : > { %s210_s22 = sand.u32 1, %s868_s20   ;;  %p983_p4 = por %p150_p13, %p36_p8 }
  0x18   : > { %p987_p6 = por %p156_p0, %p42_p10  ;;  %s590_s27 = sshll.u32 %s210_s22, 3 }
  0x19   : > { %s591_s28 = sshll.u32 %s872_s21, 3  ;;  %s214_s7 = scalar_lea.vmem [#allocation2], %s590_s27 }
  0x1a   : > { %s218_s6 = scalar_lea.hbm %s1083_s0, %s591_s28  ;;  %s222_s8 = sshll.u32 %s214_s7, 4  ;;  %s223_s8 = int_to_ptr.vmem [resolvable:$true] %s222_s8 }
  0x1b   : > { %s220_s9 = sshll.u32 %s218_s6, 4  ;;  %p997_p7 = pnand %p656_p2, %p970_p11  ;;  %s221_s9 = int_to_ptr.hbm [resolvable:$true] %s220_s9 }
  0x1c   : > { %s211_s11 = scalar_lea.sflag [#allocation3], %s210_s22  ;;  %s772_s13 = sshra.s32 %s221_s9, 4  ;;  %s773_s13 = int_to_ptr.hbm [resolvable:$true] %s772_s13 }
  0x1d   : > { %s774_s14 = scalar_lea.hbm %s773_s13, 8  ;;  %p776_p9 = pneg %p997_p7 }
  0x1e   : > { %p775_p8 = scmp.ne.s32.totalorder %s773_s13, %s774_s14  ;;  %s779_s29 = scalar_lea.hbm %s1083_s0, 16 }
  0x1f   : > { %p780_p11 = scmp.lt.s32.totalorder %s773_s13, %s1083_s0  ;;  %p781_p0 = scmp.lt.s32.totalorder %s779_s29, %s774_s14 }
  0x20   : > { %p777_p10 = pnand %p776_p9, %p775_p8 }
  0x21   : > { %p782_p2 = por %p781_p0, %p780_p11 }
  0x22   : > { %p778_p13 = pneg %p777_p10 }
  0x24   : > { %p783_p5 = pnand %p782_p2, %p778_p13 }
  0x26   : > { %786 = shalt.err (!%p783_p5)
}
  0x27   : > { %649 = dma.hbm_to_vmem [thread:$0]  (!%p997_p7), %s221_s9, 128, %s223_s8, %s211_s11  }
  0x28   : > { %231 = sbr.rel (%p943_p3) target bundleno = 971 (0x3cb), region = 40  ;;  %s1014_s22 = sand.u32 (!%p943_p3), 1, %s864_s19  }
  0x29   : > { %s593_s6 = sshll.u32 (!%p943_p3), %s1014_s22, 3  ;;  %s234_s7 = scalar_lea.sflag (!%p943_p3), [#allocation3], %s1014_s22 }
  0x2a   : > { %s237_s13 = scalar_lea.vmem (!%p943_p3), [#allocation2], %s593_s6 }
  0x2d   : > { %847 = dma.done.wait (%p976_p12), %s234_s7, 128  }
  0x2e   : > { %849 = vsyncadd (%p976_p12), %s234_s7, 4294967168 }
  0x2f   : > { %851 = dma.done.wait (%p43_p1), [#allocation6], 512  }
  0x30   : > { %853 = vsyncadd (%p43_p1), [#allocation6], 4294966784  ;;  %v624_v0 = vld [vmem:[#allocation5 + $0x8] sm:$0xff]  ;;  %v623_v1 = vld [vmem:[#allocation5] sm:$0xff]  ;;  %vm298_vm0 = vcmask 261120   ;;  %s878_s17 = smov 64  }
  0x31   : > { %308 = vmatpush.bf16.msra.mxu0 %v624_v0  ;;  %v276_v2 = vld [vmem:[%s237_s13] sm:$0xff]  ;;  %s879_s9 = smov 96   ;;  %s880_s10 = smov 112   ;;  %vm359_vm1 = vcmask 1043456   ;;  %vm323_vm2 = vcmask 130048   ;;  %vm343_vm3 = vcmask 64512  }
  0x32   : > { %v277_v3 = vpack.c.bf16 %v276_v2, %v276_v2  ;;  %v702_v4 = vld [vmem:[%s1085_s2] ss:$0 sm:$0xff]  ;;  %s881_s11 = smov 80   ;;  %s882_s14 = smov 48   ;;  %v626_v42 = vld [vmem:[#allocation7 + $0x8] sm:$0xff] }
  0x33   : > { %v625_v43 = vld [vmem:[#allocation7] sm:$0xff]  ;;  %s883_s27 = smov 16   ;;  %s620_s28 = sshll.u32 %s938_s25, 3 }
  0x34   : > { %s491_s16 = scalar_lea.hbm %s1088_s5, %s620_s28  ;;  %v703_v57 = vld [vmem:[%s1087_s4] ss:$0 sm:$0xff]  ;;  %s274_s26 = scalar_lea.vmem [#allocation8], %s593_s6 }
  0x35   : > { %309 = vmatpush.bf16.msra.mxu0 %v623_v1  ;;  %s493_s8 = sshll.u32 %s274_s26, 4  ;;  %s481_s25 = scalar_lea.sflag [#allocation4], %s1014_s22  ;;  %s494_s8 = int_to_ptr.vmem [resolvable:$true] %s493_s8 }
  0x36   : > { %s822_s6 = scalar_lea.hbm %s1088_s5, 16 }
  0x38   : > { %605 = vmatmul.msk.bf16.vlgmr.msra.gmra.mxu0 %vm298_vm0, %v277_v3 }
  0x39   : > { %472 = vmatpush.bf16.msrb.mxu0 %v626_v42 }
  0x3d   : > { %473 = vmatpush.bf16.msrb.mxu0 %v625_v43 }
  0xb5   : > { %v311_v5 = vpop.f32.mrf.mxu0 }
  0xb6   : > { %v312_v6 = vadd.f32 %v702_v4, %v311_v5 }
  0xb8   : > { %v315_v7 = vmul.f32 0.25, %v312_v6  ;;  %v317_v8 = vpack.c.bf16 %v312_v6, %v312_v6 }
  0xba   : > { %v316_v9 = vpack.c.bf16 %v315_v7, %v315_v7  ;;  %v319_v10 = vunpack.c.l.b16 %v317_v8 }
  0xbc   : > { %v320_v11 = vpack.c.b16 %v319_v10, %v319_v10  ;;  %v379_v12 = vunpack.c.l.b16 %v316_v9 }
  0xbd   : > { %v313_v13 = vpop.f32.mrf.mxu0 }
  0xbe   : > { %354 = vrot.lane.b32.xlu2 %v320_v11, %s878_s17  ;;  %321 = vrot.lane.b32.xlu0 %v320_v11, %s879_s9  ;;  %v380_v14 = vpack.c.b16 %v379_v12, %v379_v12  ;;  %s495_s17 = sshll.u32 %s491_s16, 4  ;;  %s496_s17 = int_to_ptr.hbm [resolvable:$true] %s495_s17 }
  0xbf   : > { %s816_s9 = sshra.s32 %s496_s17, 4  ;;  %s817_s9 = int_to_ptr.hbm [resolvable:$true] %s816_s9 }
  0xc0   : > { %381 = vrot.lane.b32.xlu1 %v380_v14, %s880_s10  ;;  %s818_s10 = scalar_lea.hbm %s817_s9, 8  ;;  %p823_p12 = scmp.lt.s32.totalorder %s817_s9, %s1088_s5 }
  0xc1   : > { %p819_p1 = scmp.ne.s32.totalorder %s817_s9, %s818_s10  ;;  %p824_p7 = scmp.lt.s32.totalorder %s822_s6, %s818_s10 }
  0xc3   : > { %p820_p3 = pnand %p819_p1, %p983_p4  ;;  %p825_p8 = por %p824_p7, %p823_p12 }
  0xc5   : > { %p821_p5 = pneg %p820_p3 }
  0xc6   : > { %383 = vrot.lane.b32.xlu0 %v320_v11, %s881_s11 }
  0xc7   : > { %p826_p9 = pnand %p825_p8, %p821_p5 }
  0xce   : > { %414 = vrot.lane.b32.xlu0 %v320_v11, %s882_s14 }
 0x118   : > { %v355_v15 = vpop.permute.xlu2 %354 }
 0x119   : > { %v361_v16 = vsel %vm359_vm1, %v355_v15, 0 }
 0x11a   : > { %370 = vmatpush.bf16.msra.mxu2 %v361_v16 }
 0x130   : > { %v322_v17 = vpop.permute.xlu0 %321 }
 0x131   : > { %v328_v18 = vsel %vm323_vm2, %v322_v17, 0 }
 0x132   : > { %337 = vmatpush.bf16.xpose.msra.mxu1 %v328_v18  ;;  %v382_v21 = vpop.permute.xlu1 %381 }
 0x138   : > { %v384_v19 = vpop.permute.xlu0 %383 }
 0x139   : > { %606 = vmatmul.msk.bf16.vlgmr.msra.gmra.mxu1 %vm323_vm2, %v316_v9  ;;  %v389_v20 = vsel %vm323_vm2, %v384_v19, 0 }
 0x13a   : > { %398 = vmatpush.bf16.xpose.msra.mxu3 %v389_v20 }
 0x140   : > { %v415_v22 = vpop.permute.xlu0 %414 }
 0x141   : > { %608 = vmatmul.msk.bf16.vlgmr.msra.gmra.mxu3 %vm323_vm2, %v382_v21  ;;  %v420_v23 = vsel %vm359_vm1, %v415_v22, 0 }
 0x142   : > { %429 = vmatpush.bf16.msrb.mxu2 %v420_v23 }
 0x1b6   : > { %v339_v24 = vpop.f32.mrf.mxu1 }
 0x1b7   : > { %v344_v25 = vsel %vm343_vm3, %v339_v24, -inf }
 0x1b8   : > { %345 = vmax.xlane.f32.xlu1 %v344_v25 }
 0x1be   : > { %v341_v26 = vpop.f32.mrf.mxu1 }
 0x1c4   : > { %v400_v27 = vpop.f32.mrf.mxu3 }
 0x1c5   : > { %v404_v28 = vsel %vm343_vm3, %v400_v27, -inf }
 0x1c6   : > { %405 = vmax.xlane.f32.xlu2 %v404_v28 }
 0x1cc   : > { %v402_v29 = vpop.f32.mrf.mxu3 }
 0x22b   : > { %v346_v30 = vpop.xlane.xlu1 %345 }
 0x22c   : > { %v347_v31 = vsub.f32 %v339_v24, %v346_v30 }
 0x22e   : > { %v348_v32 = vmul.f32 1.442695, %v347_v31 }
 0x230   : > { %704 = vpow2.f32 %v348_v32 }
 0x236   : > { %v705_v33 = vpop.eup %704 }
 0x237   : > { %v350_v34 = vsel %vm343_vm3, %v705_v33, 0.0  ;;  %v353_v35 = vpack.c.bf16 %v705_v33, %v705_v33 }
 0x238   : > { %351 = vadd.xlane.f32.xlu2 %v350_v34 }
 0x239   : > { %v406_v36 = vpop.xlane.xlu2 %405  ;;  %607 = vmatmul.msk.bf16.vlgmr.msra.gmra.mxu2 %vm343_vm3, %v353_v35 }
 0x23a   : > { %v407_v37 = vsub.f32 %v400_v27, %v406_v36 }
 0x23c   : > { %v408_v38 = vmul.f32 1.442695, %v407_v37 }
 0x23e   : > { %706 = vpow2.f32 %v408_v38 }
 0x244   : > { %v707_v39 = vpop.eup %706 }
 0x245   : > { %v410_v40 = vsel %vm343_vm3, %v707_v39, 0.0  ;;  %v413_v41 = vpack.c.bf16 %v707_v39, %v707_v39 }
 0x246   : > { %411 = vadd.xlane.f32.xlu0 %v410_v40 }
 0x249   : > { %609 = vmatmul.msk.bf16.vlgmr.msrb.gmra.mxu2 %vm343_vm3, %v413_v41 }
 0x2ab   : > { %v352_v51 = vpop.xlane.xlu2 %351 }
 0x2b9   : > { %v412_v45 = vpop.xlane.xlu0 %411 }
 0x2ba   : > { %708 = vrcp.f32 %v412_v45 }
 0x2bb   : > { %710 = vrcp.f32 %v352_v51 }
 0x2bc   : > { %v372_v44 = vpop.f32.mrf.mxu2 }
 0x2c0   : > { %v709_v47 = vpop.eup %708 }
 0x2c1   : > { %v711_v52 = vpop.eup %710 }
 0x2c2   : > { %v377_v53 = vmul.f32 %v711_v52, %v372_v44 }
 0x2c4   : > { %v374_v46 = vpop.f32.mrf.mxu2 }
 0x2cc   : > { %v431_v48 = vpop.f32.mrf.mxu2 }
 0x2cd   : > { %v436_v49 = vmul.f32 %v709_v47, %v431_v48 }
 0x2cf   : > { %438 = vrot.lane.b32.xlu1 %v436_v49, %s883_s27 }
 0x2d4   : > { %v433_v50 = vpop.f32.mrf.mxu2 }
 0x341   : > { %v439_v54 = vpop.permute.xlu1 %438 }
 0x342   : > { %v441_v55 = vsel %vm323_vm2, %v377_v53, %v439_v54 }
 0x343   : > { %v442_v56 = vpack.c.bf16 %v441_v55, %v441_v55 }
 0x345   : > { %618 = vmatmul.msk.bf16.vlgmr.msrb.gmra.mxu0 %vm298_vm0, %v442_v56 }
 0x3c2   : > { %v475_v58 = vpop.f32.mrf.mxu0 }
 0x3c3   : > { %v476_v59 = vadd.f32 %v703_v57, %v475_v58 }
 0x3c5   : > { %479 = vst.msk [vmem:[%s274_s26] sm:$0xff] %vm298_vm0, %v476_v59 }
 0x3c6   : > { %829 = shalt.err (!%p826_p9)
}
 0x3c7   : > { %637 = dma.vmem_to_hbm [thread:$0]  (%p983_p4), %s494_s8, 128, %s496_s17, %s481_s25  }
 0x3ca   : > { %v477_v60 = vpop.f32.mrf.mxu0 }
 0x3cb PF: > { %s507_s22 = sand.u32 1, %s860_s18   ;;  %p1095_p10 = scmp.ge.s32.totalorder %s872_s21, 2 }
 0x3cc   : > { %s508_s29 = scalar_lea.sflag [#allocation4], %s507_s22 }
 0x3cd   : > { %p651_p13 = pnand %p1095_p10, %p987_p6 }
 0x3cf   : > { %p652_p11 = pneg %p651_p13 }
 0x3d1   : > { %855 = dma.done.wait (%p652_p11), %s508_s29, 128  }
 0x3d2   : > { %857 = vsyncadd (%p652_p11), %s508_s29, 4294967168  ;;  %p19_p0 = scmp.ge.s32.totalorder %s957_s12, 4   ;;  %s1096_s18 = smov %s864_s19 }
 0x3d3   : > { %s1097_s19 = smov %s868_s20  ;;  %s1098_s20 = smov %s968_s15 }
 0x3d4   : > { %s1099_s21 = smov %s957_s12  ;;  %21 = sbr.rel (!%p19_p0) target bundleno = 6 (0x6), region = 93 }
 0x3d9   :  { %514 = vsyncpa [#allocation3], 1 }
 0x3da   :  { %516 = vsyncpa [#allocation3 + $0x1], 1 }
 0x3db   :  { %517 = vsyncpa [#allocation6], 1 }
 0x3dc   :  { %518 = vsyncpa [#allocation4], 1 }
 0x3dd   :  { %520 = vsyncpa [#allocation4 + $0x1], 1 }

</bundles_post_ra>
